<compile_context>
chip_gen: v7x
topology: tpu7x:2x2x1
jax: 0.10.0
libtpu: 0.0.40
codegen_flags: <defaults>
</compile_context>

<pallas_src>
import jax
import jax.numpy as jnp
from jax.experimental import pallas as pl
from jax.experimental.pallas import tpu as pltpu


def _tconv_matmul_kernel(x_ref, w_ref, b_ref, o_ref):
    # x_ref: (tm, Cin) compute dtype, w_ref: (Cin, N) compute dtype,
    # b_ref: (1, N) f32, o_ref: (tm, N) out dtype.  f32 MXU accumulate, f32 bias add.
    acc = jnp.dot(x_ref[...], w_ref[...], preferred_element_type=jnp.float32)
    o_ref[...] = (acc + b_ref[...]).astype(o_ref.dtype)


def _vmem_capacity_bytes():
    try:
        info = pltpu.get_tpu_info()
        cap = getattr(info, "vmem_capacity_bytes", None)
        if cap:
            return int(cap)
    except Exception:
        pass
    return 64 * 1024 * 1024  # conservative: v7x per-TensorCore VMEM


def _select_tm(M, Cin, N, cbytes, obytes, vmem_cap):
    """Largest row tile that fits comfortably in VMEM, with >= 2 grid steps when possible."""
    sub = 16 if cbytes == 2 else 8             # sublane granule of the compute dtype
    if M <= sub:
        return M
    budget = int(vmem_cap * 0.6)               # leave headroom for compiler scratch
    fixed = 2 * (Cin * N * cbytes + N * 4)     # weight + bias (pipeline double-buffers them)
    per_row = 2 * (Cin * cbytes + N * obytes)  # double-buffered x tile + out tile, per row
    tm_cap = max(sub, (budget - fixed) // per_row)
    tm = min(2048, tm_cap, -(-M // 2))         # >= 2 steps so v7x's 2 TensorCores both work
    tm = max(sub, (tm // sub) * sub)
    return min(tm, M)


def conv_transpose2x2_stride2(x_nchw, weight, bias, *, compute_dtype=jnp.bfloat16, tm=None):
    """ConvTranspose2d(kernel_size=2, stride=2, padding=0, bias=True) as one Pallas matmul."""
    B, Cin, H, W = x_nchw.shape
    Cin_w, Cout, KH, KW = weight.shape
    assert Cin == Cin_w and KH == 2 and KW == 2

    out_dtype = x_nchw.dtype
    cdt = out_dtype if compute_dtype is None else compute_dtype
    cbytes = jnp.dtype(cdt).itemsize
    obytes = jnp.dtype(out_dtype).itemsize

    M = B * H * W
    N = Cout * 4

    # Lane-dense output: pad N to a multiple of 128 when the extra columns are cheap (<= 12.5%).
    N_pad = N
    if N % 128 != 0:
        cand = ((N + 127) // 128) * 128
        if (cand - N) * 8 <= N:
            N_pad = cand

    # (B, Cin, H, W) -> (B, H, W, Cin) -> (M, Cin); the bf16 cast fuses into the transpose copy.
    x_flat = jnp.transpose(x_nchw, (0, 2, 3, 1)).reshape(M, Cin).astype(cdt)
    # PyTorch ConvTranspose2d weight is (Cin, Cout, kH, kW) -> (Cin, Cout*4),
    # column index = o*4 + kh*2 + kw.
    w_flat = weight.reshape(Cin, N).astype(cdt)
    # bias repeated over the 4 kernel taps of each output channel; keep the add in f32.
    b_flat = jnp.repeat(bias.astype(jnp.float32), 4).reshape(1, N)
    if N_pad != N:
        w_flat = jnp.pad(w_flat, ((0, 0), (0, N_pad - N)))
        b_flat = jnp.pad(b_flat, ((0, 0), (0, N_pad - N)))

    vmem_cap = _vmem_capacity_bytes()
    if tm is None:
        tm = _select_tm(M, Cin, N_pad, cbytes, obytes, vmem_cap)
    tm = min(tm, M)
    grid = (pl.cdiv(M, tm),)

    # Enough VMEM for the double-buffered tiles, clamped below the chip's capacity.
    need = 2 * (Cin * N_pad * cbytes + N_pad * 4) + 2 * tm * (Cin * cbytes + N_pad * obytes)
    vmem_limit = int(min(max(need + (8 << 20), 32 << 20), vmem_cap - (4 << 20)))
    vmem_limit = max(vmem_limit, 16 << 20)

    cost = pl.CostEstimate(
        flops=int(2 * M * Cin * N_pad),
        transcendentals=0,
        bytes_accessed=int(M * Cin * cbytes + Cin * N_pad * cbytes + N_pad * 4
                           + M * N_pad * obytes),
    )

    y_flat = pl.pallas_call(
        _tconv_matmul_kernel,
        out_shape=jax.ShapeDtypeStruct((M, N_pad), out_dtype),
        grid_spec=pltpu.PrefetchScalarGridSpec(
            num_scalar_prefetch=0,
            grid=grid,
            in_specs=[
                pl.BlockSpec((tm, Cin), lambda i: (i, 0)),
                pl.BlockSpec((Cin, N_pad), lambda i: (0, 0)),
                pl.BlockSpec((1, N_pad), lambda i: (0, 0)),
            ],
            out_specs=pl.BlockSpec((tm, N_pad), lambda i: (i, 0)),
        ),
        compiler_params=pltpu.CompilerParams(
            dimension_semantics=("parallel",),
            vmem_limit_bytes=vmem_limit,
        ),
        cost_estimate=cost,
    )(x_flat, w_flat, b_flat)

    if N_pad != N:
        y_flat = y_flat[:, :N]  # drop lane padding; XLA fuses this into the transpose below

    # (M, Cout*4) -> (B, H, W, Cout, 2, 2) -> (B, Cout, H, 2, W, 2) -> (B, Cout, 2H, 2W)
    y = y_flat.reshape(B, H, W, Cout, 2, 2)
    y = jnp.transpose(y, (0, 3, 1, 4, 2, 5)).reshape(B, Cout, 2 * H, 2 * W)
    return y


def upsampling_block(x, concat_feature, weight, bias, *, compute_dtype=jnp.bfloat16):
    """Forward of UpSamplingBlock: ConvTranspose2d(k=2, s=2) then cat((concat_feature, out), 1)."""
    tran_conv_out = conv_transpose2x2_stride2(x, weight, bias, compute_dtype=compute_dtype)
    # The concat stays in XLA: with the module's NCHW interface it is a contiguous copy into the
    # output buffer and cannot be cleanly folded into the row-tiled matmul kernel.
    return jnp.concatenate((concat_feature, tran_conv_out), axis=1)


def _reference_block(x, concat_feature, weight, bias, compute_dtype):
    # Pure-JAX reference; quantizes the matmul operands exactly like the kernel
    # (bf16 MXU operands, f32 accumulation, f32 bias add) so the comparison is tight.
    if compute_dtype is not None:
        xq = x.astype(compute_dtype).astype(jnp.float32)
        wq = weight.astype(compute_dtype).astype(jnp.float32)
    else:
        xq, wq = x, weight
    B, Cin, H, W = x.shape
    Cout = weight.shape[1]
    tc = jnp.einsum("bchw,cokl->bohkwl", xq, wq,
                    preferred_element_type=jnp.float32).reshape(B, Cout, 2 * H, 2 * W)
    tc = (tc + bias[None, :, None, None].astype(jnp.float32)).astype(x.dtype)
    return jnp.concatenate((concat_feature, tc), axis=1)


if __name__ == "__main__":
    key = jax.random.PRNGKey(0)

    # (Cin, Cout, Ccat, B, H, W):
    #   case 0: the original shapes (multi-step grid),
    #   case 1: M % tm != 0 (ragged last tile) + non-aligned tiny channels,
    #   case 2: exercises the lane-padded (4*Cout -> multiple of 128) output path.
    cases = [
        (4, 4, 4, 2, 8, 8),
        (5, 3, 3, 1, 5, 6),
        (8, 120, 16, 1, 4, 4),
    ]

    for idx, (cin, cout, ccat, b, h, w) in enumerate(cases):
        key, k_x, k_cat, k_w, k_b = jax.random.split(key, 5)
        x = jax.random.normal(k_x, (b, cin, h, w), dtype=jnp.float32)
        # concat_feature must spatially match the up-sampled output (2H, 2W)
        concat_feature = jax.random.normal(k_cat, (b, ccat, 2 * h, 2 * w), dtype=jnp.float32)
        # PyTorch ConvTranspose2d weight shape: (in_channels, out_channels, kH, kW)
        weight = jax.random.normal(k_w, (cin, cout, 2, 2), dtype=jnp.float32) * 0.1
        bias = jax.random.normal(k_b, (cout,), dtype=jnp.float32) * 0.1

        out = upsampling_block(x, concat_feature, weight, bias)
        out = jax.block_until_ready(out)

        ref = _reference_block(x, concat_feature, weight, bias, jnp.bfloat16)

        assert out.shape == (b, ccat + cout, 2 * h, 2 * w), (idx, out.shape)
        assert jnp.allclose(out, ref, atol=1e-4, rtol=1e-4), (
            idx, float(jnp.max(jnp.abs(out - ref))))

    print("KERNEL_OK")
</pallas_src>

<mosaic_0001>
module attributes {stable_mosaic.version = 11 : i64} {
  func.func @_tconv_matmul_kernel(%arg0: i32, %arg1: memref<64x4xbf16, #tpu.memory_space<vmem>>, %arg2: memref<4x16xbf16, #tpu.memory_space<vmem>>, %arg3: memref<1x16xf32, #tpu.memory_space<vmem>>, %arg4: memref<64x16xf32, #tpu.memory_space<vmem>>) attributes {dimension_semantics = [#tpu.dimension_semantics<parallel>], iteration_bounds = array<i64: 2>, scalar_prefetch = 0 : i64, scratch_operands = 0 : i64, tpu.core_type = #tpu.core_type<tc>, window_params = [{transform_indices = @transform_0, window_bounds = array<i64: 64, 4>}, {pipeline_mode = #tpu.pipeline_mode<synchronous>, transform_indices = @transform_1, window_bounds = array<i64: 4, 16>}, {pipeline_mode = #tpu.pipeline_mode<synchronous>, transform_indices = @transform_2, window_bounds = array<i64: 1, 16>}, {transform_indices = @transform_3, window_bounds = array<i64: 64, 16>}]} {
    %c0 = arith.constant 0 : index
    %c0_0 = arith.constant 0 : index
    %0 = vector.load %arg1[%c0, %c0_0] : memref<64x4xbf16, #tpu.memory_space<vmem>>, vector<64x4xbf16>
    %c0_1 = arith.constant 0 : index
    %c0_2 = arith.constant 0 : index
    %1 = vector.load %arg2[%c0_1, %c0_2] : memref<4x16xbf16, #tpu.memory_space<vmem>>, vector<4x16xbf16>
    %cst = arith.constant dense<0.000000e+00> : vector<64x16xf32>
    %2 = tpu.matmul %0, %1, %cst {dimension_numbers = #tpu.dot_dimension_numbers<[1], [0], [0], [1], [0, 0, 1, 1], [], []>} : vector<64x4xbf16>, vector<4x16xbf16>, vector<64x16xf32> -> vector<64x16xf32>
    %c0_3 = arith.constant 0 : index
    %c0_4 = arith.constant 0 : index
    %3 = vector.load %arg3[%c0_3, %c0_4] : memref<1x16xf32, #tpu.memory_space<vmem>>, vector<1x16xf32>
    %4 = vector.broadcast %3 : vector<1x16xf32> to vector<64x16xf32>
    %5 = arith.addf %2, %4 : vector<64x16xf32>
    %c0_5 = arith.constant 0 : index
    %c0_6 = arith.constant 0 : index
    %6 = vector.load %arg4[%c0_5, %c0_6] : memref<64x16xf32, #tpu.memory_space<vmem>>, vector<64x16xf32>
    tpu.vector_store %arg4[%c0_5, %c0_6], %5 {strides = array<i32>} : memref<64x16xf32, #tpu.memory_space<vmem>>, vector<64x16xf32>,
    return
  }
  func.func @transform_0(%arg0: i32) -> (i32, i32) {
    %c0_i32 = arith.constant 0 : i32
    %c0_i32_0 = arith.constant 0 : i32
    return %arg0, %c0_i32 : i32, i32
  }
  func.func @transform_1(%arg0: i32) -> (i32, i32) {
    %c0_i32 = arith.constant 0 : i32
    %c0_i32_0 = arith.constant 0 : i32
    %c0_i32_1 = arith.constant 0 : i32
    return %c0_i32, %c0_i32_0 : i32, i32
  }
  func.func @transform_2(%arg0: i32) -> (i32, i32) {
    %c0_i32 = arith.constant 0 : i32
    %c0_i32_0 = arith.constant 0 : i32
    %c0_i32_1 = arith.constant 0 : i32
    return %c0_i32, %c0_i32_0 : i32, i32
  }
  func.func @transform_3(%arg0: i32) -> (i32, i32) {
    %c0_i32 = arith.constant 0 : i32
    %c0_i32_0 = arith.constant 0 : i32
    return %arg0, %c0_i32 : i32, i32
  }
}

</mosaic_0001>

<bundles_post_ra>
// kernel: tpu_custom_call.1
= control target key start
LH: loop header
LB: loop body
LE: loop exit
PB: predicated region body
PF: predicated region fallthrough
CT: control target
= control target key end

     0   :  { %s437_s12 = smov 0   ;;  %s468_s0 = inlined_call_operand.vmem [shape: bf16[128,4], index: 0, kind: input, shape index: {}]   ;;  %s469_s1 = inlined_call_operand.vmem [shape: bf16[4,16], index: 1, kind: input, shape index: {}]   ;;  %s470_s2 = inlined_call_operand.vmem [shape: f32[1,16], index: 2, kind: input, shape index: {}]   ;;  %s471_s3 = inlined_call_operand.vmem [shape: f32[128,16], index: 3, kind: output, shape index: {}]  }
   0x1 LB: > { %s358_s13 = sadd.s32 4294967295, %s415_s12   ;;  %p362_p0 = scmp.ge.s32.totalorder %s415_s12, 1  ;;  %s415_s12 = sphi %s437_s12, %s13_s12  }
   0x2   : > { %p138_p1 = scmp.lt.s32.totalorder %s415_s12, 3 }
   0x4   : > { %p139_p2 = pnand %p362_p0, %p138_p1 }
   0x5   : > { %v183_v0 = vld [vmem:[%s469_s1] sm:$0x3] (!%p139_p2)  ;;  %vm224_vm0 = vcmask (!%p139_p2), 1041408   ;;  %s363_s16 = sshll.u32 (!%p139_p2), %s358_s13, 3  ;;  %vm211_vm1 = vcmask (!%p139_p2), 31744   ;;  %vm293_vm2 = vcmask (!%p139_p2), 130048  }
   0x6   : > { %142 = sbr.rel (%p139_p2) target bundleno = 236 (0xec), region = 32  ;;  %395 = vmatprep.subr.msk.bf16.mxu0 (!%p139_p2), %vm224_vm0, %v183_v0  ;;  %396 = vmatprep.subr.msk.bf16.mxu1 (!%p139_p2), %vm224_vm0, %v183_v0  ;;  %v226_v1 = vsel (!%p139_p2), %vm224_vm0, %v183_v0, 0  ;;  %p163_p3 = scmp.lt.s32.totalorder (!%p139_p2), %s363_s16, 15  ;;  %v367_v6 = vld [vmem:[%s470_s2] ss:$0 sm:$0xff] (!%p139_p2) }
   0x7   : > { %384 = vmatpush3.bf16.msra.mxu0 (!%p139_p2), %v226_v1  ;;  %394 = vmatpush3.bf16.msra.mxu1 (!%p139_p2), %v226_v1 }
   0xd   : > { %s473_s16 = smov (!%p163_p3, %s363_s16), 15 }
   0xe   : > { %s364_s17 = sshll.u32 %s473_s16, 2  ;;  %s366_s21 = sshll.u32 %s473_s16, 3 }
   0xf   : > { %s166_s20 = scalar_lea.vmem %s468_s0, %s364_s17  ;;  %s172_s26 = scalar_lea.vmem %s471_s3, %s366_s21 }
  0x10   : > { %v405_v2 = vld [vmem:[%s166_s20] sm:$0xff]   ;;  %v406_v3 = vld [vmem:[%s166_s20 + $0x10] sm:$0xff]   ;;  %v407_v4 = vld [vmem:[%s166_s20 + $0x8] sm:$0xff]  }
  0x11   : > { %385 = vmatprep.mubr.msk.bf16.mxu0 %vm211_vm1, %v405_v2  ;;  %389 = vmatprep.mubr.msk.bf16.mxu1 %vm211_vm1, %v406_v3  ;;  %v408_v5 = vld [vmem:[%s166_s20 + $0x18] sm:$0xff]  }
  0x12   : > { %386 = vmatmul.mubr.msk.bf16.vlgmr.msra.gmra.mrb[0].mxu0 %vm211_vm1, %v407_v4  ;;  %390 = vmatmul.mubr.msk.bf16.vlgmr.msra.gmra.mrb[0].mxu1 %vm211_vm1, %v408_v5 }
  0xe5   : > { %v387_v7 = vpop.f32.mrb[0].mxu0  ;;  %v391_v9 = vpop.f32.mrb[0].mxu1 }
  0xe6   : > { %v271_v8 = vadd.f32 %v387_v7, %v367_v6  ;;  %v262_v10 = vpop.f32.mrb[1].mxu0  ;;  %v287_v11 = vadd.f32 %v391_v9, %v367_v6  ;;  %v278_v13 = vpop.f32.mrb[1].mxu1 }
  0xe7   : > { %v263_v12 = vadd.f32 %v367_v6, %v262_v10  ;;  %v388_v14 = vpop.f32.mrb[2].mxu0  ;;  %v279_v15 = vadd.f32 %v367_v6, %v278_v13  ;;  %v392_v17 = vpop.f32.mrb[2].mxu1 }
  0xe8   : > { %296 = vst.msk [vmem:[%s172_s26 + $0x10] sm:$0xff] %vm293_vm2, %v271_v8  ;;  %v274_v16 = vadd.f32 %v388_v14, %v367_v6  ;;  %v265_v18 = vpop.f32.mrb[3].mxu0  ;;  %300 = vst.msk [vmem:[%s172_s26 + $0x30] sm:$0xff] %vm293_vm2, %v287_v11  ;;  %v290_v19 = vadd.f32 %v392_v17, %v367_v6  ;;  %v281_v21 = vpop.f32.mrb[3].mxu1 }
  0xe9   : > { %294 = vst.msk [vmem:[%s172_s26] sm:$0xff] %vm293_vm2, %v263_v12  ;;  %v266_v20 = vadd.f32 %v367_v6, %v265_v18  ;;  %298 = vst.msk [vmem:[%s172_s26 + $0x20] sm:$0xff] %vm293_vm2, %v279_v15  ;;  %v282_v22 = vadd.f32 %v367_v6, %v281_v21 }
  0xea   : > { %297 = vst.msk [vmem:[%s172_s26 + $0x18] sm:$0xff] %vm293_vm2, %v274_v16  ;;  %301 = vst.msk [vmem:[%s172_s26 + $0x38] sm:$0xff] %vm293_vm2, %v290_v19 }
  0xeb   : > { %295 = vst.msk [vmem:[%s172_s26 + $0x8] sm:$0xff] %vm293_vm2, %v266_v20  ;;  %299 = vst.msk [vmem:[%s172_s26 + $0x28] sm:$0xff] %vm293_vm2, %v282_v22 }
  0xec PF: > { %s13_s12 = sadd.s32 1, %s415_s12  }
  0xed   : > { %p10_p4 = scmp.ge.s32.totalorder %s13_s12, 4  }
  0xef   :  { %12 = sbr.rel (!%p10_p4) target bundleno = 1 (0x1), region = 62 }

</bundles_post_ra>
